<compile_context>
chip_gen: v7x
topology: tpu7x:2x2x1
jax: 0.10.0
libtpu: 0.0.40
codegen_flags: <defaults>
</compile_context>

<pallas_src>
import functools

import jax
import jax.numpy as jnp
import numpy as np
from jax import lax
from jax.experimental import pallas as pl
from jax.experimental.pallas import tpu as pltpu


def _pick_batch_block(B, per_item_bytes, max_bb=8, vmem_budget=8 << 20):
    """Largest divisor of B (<= max_bb) whose double-buffered block fits the budget."""
    best = 1
    for bb in range(1, min(B, max_bb) + 1):
        if B % bb:
            continue
        if 2 * bb * per_item_bytes <= vmem_budget:
            best = bb
    return best


# ----------------------------------------------------------------------------
# Kernel 1: per-layer hot path, one grid step per `bb` batch elements.
#   embedding = conv1x1( avgpool(x) + maxpool(x) )                 -> (R,)
#   CAM       = conv1x1( x + linearize(x) )                         -> (R, HW)
#   certainty = std over spatial of CAM (unbiased, like torch .std) -> (R,)
# ----------------------------------------------------------------------------
def _layer_kernel(x_ref, w_ref, brow_ref, bcol_ref, emb_ref, cam_ref, cert_ref):
    w = w_ref[...]            # (R, C)
    brow = brow_ref[...]      # (1, R)
    bcol = bcol_ref[...]      # (R, 1)
    bb, C, HW = x_ref.shape
    inv_hw = jnp.float32(1.0 / HW)
    inv_hw_m1 = jnp.float32(1.0 / max(HW - 1, 1))   # guard HW == 1

    for bi in range(bb):      # static unroll over the per-step batch block
        x = x_ref[bi]         # (C, HW) f32

        # --- pooled features -> embedding --------------------------------
        mx = jnp.max(x, axis=-1, keepdims=True)            # (C, 1)
        mean = jnp.sum(x, axis=-1, keepdims=True) * inv_hw  # (C, 1)
        pooled = mean + mx                                  # (C, 1)
        emb = lax.dot_general(pooled, w, (((0,), (1,)), ((), ())),
                              preferred_element_type=jnp.float32)  # (1, R)
        emb_ref[bi] = emb + brow

        # --- linearize fused: x + onehot*max*HW == where(x==max, x*(HW+1), x)
        xp = jnp.where(x == mx, x * jnp.float32(HW + 1), x)        # (C, HW)

        # --- CAM: single (R,C)x(C,HW) MXU matmul --------------------------
        cam = lax.dot_general(w, xp, (((1,), (0,)), ((), ())),
                              preferred_element_type=jnp.float32) + bcol  # (R, HW)
        cam_ref[bi] = cam

        # --- certainty: unbiased std over the spatial axis ----------------
        m = jnp.sum(cam, axis=-1, keepdims=True) * inv_hw           # (R, 1)
        d = cam - m
        var = jnp.sum(d * d, axis=-1) * inv_hw_m1                   # (R,)
        cert_ref[bi, 0] = jnp.sqrt(var)


def layer_forward(x_flat, w, b):
    """x_flat: (B, C, HW) f32, w: (R, C), b: (R,) -> (emb (B,R), cam (B,R,HW), cert (B,R))."""
    B, C, HW = x_flat.shape
    R = w.shape[0]
    per_item = 4 * (C * HW + R * HW + 2 * R)     # f32 in+out bytes per batch element
    bb = _pick_batch_block(B, per_item)
    brow = b.reshape(1, R)
    bcol = b.reshape(R, 1)
    emb3, cam, cert3 = pl.pallas_call(
        _layer_kernel,
        grid=(B // bb,),
        in_specs=[
            pl.BlockSpec((bb, C, HW), lambda i: (i, 0, 0)),
            pl.BlockSpec((R, C), lambda i: (0, 0)),
            pl.BlockSpec((1, R), lambda i: (0, 0)),
            pl.BlockSpec((R, 1), lambda i: (0, 0)),
        ],
        out_specs=[
            pl.BlockSpec((bb, 1, R), lambda i: (i, 0, 0)),
            pl.BlockSpec((bb, R, HW), lambda i: (i, 0, 0)),
            pl.BlockSpec((bb, 1, R), lambda i: (i, 0, 0)),
        ],
        out_shape=[
            jax.ShapeDtypeStruct((B, 1, R), jnp.float32),
            jax.ShapeDtypeStruct((B, R, HW), jnp.float32),
            jax.ShapeDtypeStruct((B, 1, R), jnp.float32),
        ],
        compiler_params=pltpu.CompilerParams(dimension_semantics=("parallel",)),
    )(x_flat, w, brow, bcol)
    return emb3.reshape(B, R), cam, cert3.reshape(B, R)


# ----------------------------------------------------------------------------
# Kernel 2: link (omega) between consecutive CAMs, with the adaptive average
# pooling of the LOW CAM fused in as a pooling-matrix matmul.
#   links = einsum('bmi,bni->mn', l2norm(pool(low)), l2norm(high)) / B
# Grid over B ("arbitrary"): the (R,R) output block is resident and accumulated.
# ----------------------------------------------------------------------------
def _link_kernel(low_ref, high_ref, p_ref, out_ref, *, inv_batch):
    pool = p_ref[...]         # (HWl, HWh) constant adaptive-avg-pool matrix
    bb = low_ref.shape[0]

    g_sum = jnp.zeros(out_ref.shape, jnp.float32)
    for bi in range(bb):      # static unroll over the per-step batch block
        low = low_ref[bi]     # (R, HWl)
        high = high_ref[bi]   # (R, HWh)

        # fused adaptive average pooling (MXU)
        low_p = lax.dot_general(low, pool, (((1,), (0,)), ((), ())),
                                preferred_element_type=jnp.float32)    # (R, HWh)

        # inverse L2 norms via rsqrt (EUP); matches F.normalize(p=2, eps=1e-12)
        inv_l = lax.rsqrt(jnp.maximum(
            jnp.sum(low_p * low_p, axis=-1, keepdims=True), 1e-24))    # (R, 1)
        inv_h = lax.rsqrt(jnp.maximum(
            jnp.sum(high * high, axis=-1, keepdims=True), 1e-24))      # (R, 1)

        hn = high * inv_h                                              # (R, HWh)
        g = lax.dot_general(low_p, hn, (((1,), (1,)), ((), ())),
                            preferred_element_type=jnp.float32)        # (R, R)
        g_sum = g_sum + g * inv_l      # row-normalize low on the tiny (R,R) tile

    @pl.when(pl.program_id(0) == 0)
    def _():
        out_ref[...] = jnp.zeros_like(out_ref)

    out_ref[...] += g_sum * jnp.float32(inv_batch)


def link_forward(low_flat, high_flat, pool_mat):
    """low_flat: (B,R,HWl), high_flat: (B,R,HWh), pool_mat: (HWl,HWh) -> (R,R)."""
    B, R, HWl = low_flat.shape
    HWh = high_flat.shape[-1]
    per_item = 4 * (R * HWl + R * HWh)
    bb = _pick_batch_block(B, per_item)
    return pl.pallas_call(
        functools.partial(_link_kernel, inv_batch=1.0 / B),
        grid=(B // bb,),
        in_specs=[
            pl.BlockSpec((bb, R, HWl), lambda i: (i, 0, 0)),
            pl.BlockSpec((bb, R, HWh), lambda i: (i, 0, 0)),
            pl.BlockSpec((HWl, HWh), lambda i: (0, 0)),
        ],
        out_specs=pl.BlockSpec((R, R), lambda i: (0, 0)),
        out_shape=jax.ShapeDtypeStruct((R, R), jnp.float32),
        compiler_params=pltpu.CompilerParams(dimension_semantics=("arbitrary",)),
    )(low_flat, high_flat, pool_mat)


# ----------------------------------------------------------------------------
# Host-side helpers
# ----------------------------------------------------------------------------
def _adaptive_pool_1d(in_size, out_size):
    """Row-stochastic matrix (out_size, in_size) implementing torch adaptive avg pool."""
    p = np.zeros((out_size, in_size), np.float32)
    for i in range(out_size):
        start = (i * in_size) // out_size
        end = -(-((i + 1) * in_size) // out_size)  # ceil
        p[i, start:end] = 1.0 / (end - start)
    return p


def adaptive_pool_matrix(in_hw, out_hw):
    """(Hin*Win, Hout*Wout) matrix so that flat_pooled = flat_in @ P."""
    Hi, Wi = in_hw
    Ho, Wo = out_hw
    ph = _adaptive_pool_1d(Hi, Ho)   # (Ho, Hi)
    pw = _adaptive_pool_1d(Wi, Wo)   # (Wo, Wi)
    p = np.einsum('ih,jw->hwij', ph, pw).reshape(Hi * Wi, Ho * Wo)
    return jnp.asarray(p, dtype=jnp.float32)


def adaptive_avg_pool2d(x, out_hw):
    """Pure-JAX pooling, used only by the reference implementation."""
    B, R, H, W = x.shape
    Ho, Wo = out_hw
    if (H, W) == (Ho, Wo):
        return x
    assert H % Ho == 0 and W % Wo == 0
    return x.reshape(B, R, Ho, H // Ho, Wo, W // Wo).mean(axis=(3, 5))


# ----------------------------------------------------------------------------
# AVSL_Graph forward (training path) in JAX + Pallas
# ----------------------------------------------------------------------------
class AVSLGraphPallas:
    def __init__(self, output_channels, n_layers, R, key):
        self.output_channels = list(output_channels)
        self.n_layers = n_layers
        self.R = R
        self.weights = []
        self.biases = []
        keys = jax.random.split(key, len(self.output_channels))
        for k, dim in zip(keys, self.output_channels):
            # kaiming_normal_(mode='fan_out'): fan_out = R*1*1, gain = sqrt(2)
            std = float(np.sqrt(2.0 / R))
            self.weights.append(jax.random.normal(k, (R, dim), dtype=jnp.float32) * std)
            self.biases.append(jnp.zeros((R,), dtype=jnp.float32))

    def __call__(self, feature_maps):
        # training-mode forward: (embeddings, certainties, links)
        embeddings, certainties, cams, shapes = [], [], [], []
        for l, fmap in enumerate(feature_maps):
            B, C, H, W = fmap.shape
            x_flat = fmap.astype(jnp.float32).reshape(B, C, H * W)
            emb, cam, cert = layer_forward(x_flat, self.weights[l], self.biases[l])
            embeddings.append(emb)
            certainties.append(cert)
            cams.append(cam)            # kept flat: (B, R, H*W)
            shapes.append((H, W))

        links = []
        for l in range(1, self.n_layers):
            pool_mat = adaptive_pool_matrix(shapes[l - 1], shapes[l])
            links.append(link_forward(cams[l - 1], cams[l], pool_mat))
        # TODO(synk): eval path of the PyTorch module calls self.get_CAM which does
        # not exist (upstream bug); only the training path is implemented.
        return embeddings, certainties, links


# ----------------------------------------------------------------------------
# Pure-JAX reference (numerical sanity check)
# ----------------------------------------------------------------------------
def reference_forward(model, feature_maps):
    embeddings, certainties, cams = [], [], []
    for l, fmap in enumerate(feature_maps):
        B, C, H, W = fmap.shape
        x = fmap.reshape(B, C, H * W)
        w, b = model.weights[l], model.biases[l]
        pooled = x.mean(-1) + x.max(-1)
        emb = pooled @ w.T + b
        mx = x.max(-1, keepdims=True)
        xp = x + (x == mx).astype(jnp.float32) * mx * (H * W)
        cam = jnp.einsum('rc,bci->bri', w, xp) + b[None, :, None]
        m = cam.mean(-1, keepdims=True)
        cert = jnp.sqrt(((cam - m) ** 2).sum(-1) / (H * W - 1))
        embeddings.append(emb)
        certainties.append(cert)
        cams.append(cam.reshape(B, model.R, H, W))
    links = []
    for l in range(1, model.n_layers):
        high = cams[l]
        B, R, Hh, Wh = high.shape
        low = adaptive_avg_pool2d(cams[l - 1], (Hh, Wh)).reshape(B, R, Hh * Wh)
        high = high.reshape(B, R, Hh * Wh)

        def l2n(v):
            n = jnp.sqrt((v * v).sum(-1, keepdims=True))
            return v / jnp.maximum(n, 1e-12)

        links.append(jnp.einsum('bmi,bni->mn', l2n(low), l2n(high)) / B)
    return embeddings, certainties, links


if __name__ == "__main__":
    key = jax.random.PRNGKey(0)
    k_model, k0, k1, k2 = jax.random.split(key, 4)

    output_channels = [4, 8, 16]
    n_layers = 3
    R = 8
    B = 2

    # Feature pyramid: NCHW, spatial halves each layer.
    feature_maps = [
        jax.random.normal(k0, (B, 4, 16, 16), dtype=jnp.float32),
        jax.random.normal(k1, (B, 8, 8, 8), dtype=jnp.float32),
        jax.random.normal(k2, (B, 16, 4, 4), dtype=jnp.float32),
    ]

    model = AVSLGraphPallas(output_channels, n_layers, R, k_model)

    embeddings, certainties, links = model(feature_maps)
    jax.block_until_ready(embeddings)
    jax.block_until_ready(certainties)
    jax.block_until_ready(links)

    # Numerical sanity check against a pure-JAX reference (all f32).
    ref_emb, ref_cert, ref_links = reference_forward(model, feature_maps)
    for a, b in zip(embeddings, ref_emb):
        np.testing.assert_allclose(np.asarray(a), np.asarray(b), rtol=1e-4, atol=1e-4)
    for a, b in zip(certainties, ref_cert):
        np.testing.assert_allclose(np.asarray(a), np.asarray(b), rtol=1e-4, atol=1e-4)
    for a, b in zip(links, ref_links):
        np.testing.assert_allclose(np.asarray(a), np.asarray(b), rtol=1e-4, atol=1e-4)

    print("KERNEL_OK")
</pallas_src>

<mosaic_0001>
module attributes {stable_mosaic.version = 11 : i64} {
  func.func @_layer_kernel(%arg0: i32, %arg1: memref<2x4x256xf32, #tpu.memory_space<vmem>>, %arg2: memref<8x4xf32, #tpu.memory_space<vmem>>, %arg3: memref<1x8xf32, #tpu.memory_space<vmem>>, %arg4: memref<8x1xf32, #tpu.memory_space<vmem>>, %arg5: memref<2x1x8xf32, #tpu.memory_space<vmem>>, %arg6: memref<2x8x256xf32, #tpu.memory_space<vmem>>, %arg7: memref<2x1x8xf32, #tpu.memory_space<vmem>>) attributes {dimension_semantics = [#tpu.dimension_semantics<parallel>], iteration_bounds = array<i64: 1>, scalar_prefetch = 0 : i64, scratch_operands = 0 : i64, tpu.core_type = #tpu.core_type<tc>, window_params = [{transform_indices = @transform_0, window_bounds = array<i64: 2, 4, 256>}, {pipeline_mode = #tpu.pipeline_mode<synchronous>, transform_indices = @transform_1, window_bounds = array<i64: 8, 4>}, {pipeline_mode = #tpu.pipeline_mode<synchronous>, transform_indices = @transform_2, window_bounds = array<i64: 1, 8>}, {pipeline_mode = #tpu.pipeline_mode<synchronous>, transform_indices = @transform_3, window_bounds = array<i64: 8, 1>}, {transform_indices = @transform_4, window_bounds = array<i64: 2, 1, 8>}, {transform_indices = @transform_5, window_bounds = array<i64: 2, 8, 256>}, {transform_indices = @transform_6, window_bounds = array<i64: 2, 1, 8>}]} {
    %c0 = arith.constant 0 : index
    %c0_0 = arith.constant 0 : index
    %0 = vector.load %arg2[%c0, %c0_0] : memref<8x4xf32, #tpu.memory_space<vmem>>, vector<8x4xf32>
    %c0_1 = arith.constant 0 : index
    %c0_2 = arith.constant 0 : index
    %1 = vector.load %arg3[%c0_1, %c0_2] : memref<1x8xf32, #tpu.memory_space<vmem>>, vector<1x8xf32>
    %c0_3 = arith.constant 0 : index
    %c0_4 = arith.constant 0 : index
    %2 = vector.load %arg4[%c0_3, %c0_4] : memref<8x1xf32, #tpu.memory_space<vmem>>, vector<8x1xf32>
    %c0_5 = arith.constant 0 : index
    %c0_6 = arith.constant 0 : index
    %c0_7 = arith.constant 0 : index
    %3 = vector.load %arg1[%c0_5, %c0_6, %c0_7] : memref<2x4x256xf32, #tpu.memory_space<vmem>>, vector<1x4x256xf32>
    %4 = vector.shape_cast %3 : vector<1x4x256xf32> to vector<4x256xf32>
    %cst = arith.constant dense<0xFF800000> : vector<4xf32>
    %5 = vector.multi_reduction <maximumf>, %4, %cst [1] : vector<4x256xf32> to vector<4xf32>
    %6 = vector.shape_cast %5 : vector<4xf32> to vector<4x1xf32>
    %cst_8 = arith.constant dense<0.000000e+00> : vector<4xf32>
    %7 = vector.multi_reduction <add>, %4, %cst_8 [1] : vector<4x256xf32> to vector<4xf32>
    %8 = vector.shape_cast %7 : vector<4xf32> to vector<4x1xf32>
    %cst_9 = arith.constant 3.906250e-03 : f32
    %9 = vector.broadcast %cst_9 : f32 to vector<4x1xf32>
    %10 = arith.mulf %8, %9 : vector<4x1xf32>
    %11 = arith.addf %10, %6 : vector<4x1xf32>
    %cst_10 = arith.constant dense<0.000000e+00> : vector<1x8xf32>
    %12 = tpu.matmul %11, %0, %cst_10 {dimension_numbers = #tpu.dot_dimension_numbers<[0], [1], [1], [0], [0, 1, 1, 0], [], []>} : vector<4x1xf32>, vector<8x4xf32>, vector<1x8xf32> -> vector<1x8xf32>
    %13 = arith.addf %12, %1 : vector<1x8xf32>
    %c0_11 = arith.constant 0 : index
    %c0_12 = arith.constant 0 : index
    %c0_13 = arith.constant 0 : index
    %14 = vector.load %arg5[%c0_11, %c0_12, %c0_13] : memref<2x1x8xf32, #tpu.memory_space<vmem>>, vector<1x1x8xf32>
    %15 = vector.shape_cast %14 : vector<1x1x8xf32> to vector<1x8xf32>
    %16 = vector.shape_cast %13 : vector<1x8xf32> to vector<1x1x8xf32>
    tpu.vector_store %arg5[%c0_11, %c0_12, %c0_13], %16 {strides = array<i32>} : memref<2x1x8xf32, #tpu.memory_space<vmem>>, vector<1x1x8xf32>,
    %17 = vector.broadcast %6 : vector<4x1xf32> to vector<4x256xf32>
    %18 = arith.cmpf oeq, %4, %17 : vector<4x256xf32>
    %cst_14 = arith.constant 2.570000e+02 : f32
    %19 = vector.broadcast %cst_14 : f32 to vector<4x256xf32>
    %20 = arith.mulf %4, %19 : vector<4x256xf32>
    %21 = arith.select %18, %20, %4 : vector<4x256xi1>, vector<4x256xf32>
    %cst_15 = arith.constant dense<0.000000e+00> : vector<8x256xf32>
    %22 = tpu.matmul %0, %21, %cst_15 {dimension_numbers = #tpu.dot_dimension_numbers<[1], [0], [0], [1], [0, 0, 1, 1], [], []>} : vector<8x4xf32>, vector<4x256xf32>, vector<8x256xf32> -> vector<8x256xf32>
    %23 = vector.broadcast %2 : vector<8x1xf32> to vector<8x256xf32>
    %24 = arith.addf %22, %23 : vector<8x256xf32>
    %c0_16 = arith.constant 0 : index
    %c0_17 = arith.constant 0 : index
    %c0_18 = arith.constant 0 : index
    %25 = vector.load %arg6[%c0_16, %c0_17, %c0_18] : memref<2x8x256xf32, #tpu.memory_space<vmem>>, vector<1x8x256xf32>
    %26 = vector.shape_cast %25 : vector<1x8x256xf32> to vector<8x256xf32>
    %27 = vector.shape_cast %24 : vector<8x256xf32> to vector<1x8x256xf32>
    tpu.vector_store %arg6[%c0_16, %c0_17, %c0_18], %27 {strides = array<i32>} : memref<2x8x256xf32, #tpu.memory_space<vmem>>, vector<1x8x256xf32>,
    %cst_19 = arith.constant dense<0.000000e+00> : vector<8xf32>
    %28 = vector.multi_reduction <add>, %24, %cst_19 [1] : vector<8x256xf32> to vector<8xf32>
    %29 = vector.shape_cast %28 : vector<8xf32> to vector<8x1xf32>
    %cst_20 = arith.constant 3.906250e-03 : f32
    %30 = vector.broadcast %cst_20 : f32 to vector<8x1xf32>
    %31 = arith.mulf %29, %30 : vector<8x1xf32>
    %32 = vector.broadcast %31 : vector<8x1xf32> to vector<8x256xf32>
    %33 = arith.subf %24, %32 : vector<8x256xf32>
    %34 = arith.mulf %33, %33 : vector<8x256xf32>
    %cst_21 = arith.constant dense<0.000000e+00> : vector<8xf32>
    %35 = vector.multi_reduction <add>, %34, %cst_21 [1] : vector<8x256xf32> to vector<8xf32>
    %cst_22 = arith.constant 0.00392156886 : f32
    %36 = vector.broadcast %cst_22 : f32 to vector<8xf32>
    %37 = arith.mulf %35, %36 : vector<8xf32>
    %38 = math.sqrt %37 : vector<8xf32>
    %c0_23 = arith.constant 0 : index
    %c0_24 = arith.constant 0 : index
    %c0_25 = arith.constant 0 : index
    %39 = vector.load %arg7[%c0_23, %c0_24, %c0_25] : memref<2x1x8xf32, #tpu.memory_space<vmem>>, vector<1x1x8xf32>
    %40 = vector.shape_cast %39 : vector<1x1x8xf32> to vector<8xf32>
    %41 = vector.shape_cast %38 : vector<8xf32> to vector<1x1x8xf32>
    tpu.vector_store %arg7[%c0_23, %c0_24, %c0_25], %41 {strides = array<i32>} : memref<2x1x8xf32, #tpu.memory_space<vmem>>, vector<1x1x8xf32>,
    %c1 = arith.constant 1 : index
    %c0_26 = arith.constant 0 : index
    %c0_27 = arith.constant 0 : index
    %42 = vector.load %arg1[%c1, %c0_26, %c0_27] : memref<2x4x256xf32, #tpu.memory_space<vmem>>, vector<1x4x256xf32>
    %43 = vector.shape_cast %42 : vector<1x4x256xf32> to vector<4x256xf32>
    %cst_28 = arith.constant dense<0xFF800000> : vector<4xf32>
    %44 = vector.multi_reduction <maximumf>, %43, %cst_28 [1] : vector<4x256xf32> to vector<4xf32>
    %45 = vector.shape_cast %44 : vector<4xf32> to vector<4x1xf32>
    %cst_29 = arith.constant dense<0.000000e+00> : vector<4xf32>
    %46 = vector.multi_reduction <add>, %43, %cst_29 [1] : vector<4x256xf32> to vector<4xf32>
    %47 = vector.shape_cast %46 : vector<4xf32> to vector<4x1xf32>
    %cst_30 = arith.constant 3.906250e-03 : f32
    %48 = vector.broadcast %cst_30 : f32 to vector<4x1xf32>
    %49 = arith.mulf %47, %48 : vector<4x1xf32>
    %50 = arith.addf %49, %45 : vector<4x1xf32>
    %cst_31 = arith.constant dense<0.000000e+00> : vector<1x8xf32>
    %51 = tpu.matmul %50, %0, %cst_31 {dimension_numbers = #tpu.dot_dimension_numbers<[0], [1], [1], [0], [0, 1, 1, 0], [], []>} : vector<4x1xf32>, vector<8x4xf32>, vector<1x8xf32> -> vector<1x8xf32>
    %52 = arith.addf %51, %1 : vector<1x8xf32>
    %c1_32 = arith.constant 1 : index
    %c0_33 = arith.constant 0 : index
    %c0_34 = arith.constant 0 : index
    %53 = vector.load %arg5[%c1_32, %c0_33, %c0_34] : memref<2x1x8xf32, #tpu.memory_space<vmem>>, vector<1x1x8xf32>
    %54 = vector.shape_cast %53 : vector<1x1x8xf32> to vector<1x8xf32>
    %55 = vector.shape_cast %52 : vector<1x8xf32> to vector<1x1x8xf32>
    tpu.vector_store %arg5[%c1_32, %c0_33, %c0_34], %55 {strides = array<i32>} : memref<2x1x8xf32, #tpu.memory_space<vmem>>, vector<1x1x8xf32>,
    %56 = vector.broadcast %45 : vector<4x1xf32> to vector<4x256xf32>
    %57 = arith.cmpf oeq, %43, %56 : vector<4x256xf32>
    %cst_35 = arith.constant 2.570000e+02 : f32
    %58 = vector.broadcast %cst_35 : f32 to vector<4x256xf32>
    %59 = arith.mulf %43, %58 : vector<4x256xf32>
    %60 = arith.select %57, %59, %43 : vector<4x256xi1>, vector<4x256xf32>
    %cst_36 = arith.constant dense<0.000000e+00> : vector<8x256xf32>
    %61 = tpu.matmul %0, %60, %cst_36 {dimension_numbers = #tpu.dot_dimension_numbers<[1], [0], [0], [1], [0, 0, 1, 1], [], []>} : vector<8x4xf32>, vector<4x256xf32>, vector<8x256xf32> -> vector<8x256xf32>
    %62 = vector.broadcast %2 : vector<8x1xf32> to vector<8x256xf32>
    %63 = arith.addf %61, %62 : vector<8x256xf32>
    %c1_37 = arith.constant 1 : index
    %c0_38 = arith.constant 0 : index
    %c0_39 = arith.constant 0 : index
    %64 = vector.load %arg6[%c1_37, %c0_38, %c0_39] : memref<2x8x256xf32, #tpu.memory_space<vmem>>, vector<1x8x256xf32>
    %65 = vector.shape_cast %64 : vector<1x8x256xf32> to vector<8x256xf32>
    %66 = vector.shape_cast %63 : vector<8x256xf32> to vector<1x8x256xf32>
    tpu.vector_store %arg6[%c1_37, %c0_38, %c0_39], %66 {strides = array<i32>} : memref<2x8x256xf32, #tpu.memory_space<vmem>>, vector<1x8x256xf32>,
    %cst_40 = arith.constant dense<0.000000e+00> : vector<8xf32>
    %67 = vector.multi_reduction <add>, %63, %cst_40 [1] : vector<8x256xf32> to vector<8xf32>
    %68 = vector.shape_cast %67 : vector<8xf32> to vector<8x1xf32>
    %cst_41 = arith.constant 3.906250e-03 : f32
    %69 = vector.broadcast %cst_41 : f32 to vector<8x1xf32>
    %70 = arith.mulf %68, %69 : vector<8x1xf32>
    %71 = vector.broadcast %70 : vector<8x1xf32> to vector<8x256xf32>
    %72 = arith.subf %63, %71 : vector<8x256xf32>
    %73 = arith.mulf %72, %72 : vector<8x256xf32>
    %cst_42 = arith.constant dense<0.000000e+00> : vector<8xf32>
    %74 = vector.multi_reduction <add>, %73, %cst_42 [1] : vector<8x256xf32> to vector<8xf32>
    %cst_43 = arith.constant 0.00392156886 : f32
    %75 = vector.broadcast %cst_43 : f32 to vector<8xf32>
    %76 = arith.mulf %74, %75 : vector<8xf32>
    %77 = math.sqrt %76 : vector<8xf32>
    %c1_44 = arith.constant 1 : index
    %c0_45 = arith.constant 0 : index
    %c0_46 = arith.constant 0 : index
    %78 = vector.load %arg7[%c1_44, %c0_45, %c0_46] : memref<2x1x8xf32, #tpu.memory_space<vmem>>, vector<1x1x8xf32>
    %79 = vector.shape_cast %78 : vector<1x1x8xf32> to vector<8xf32>
    %80 = vector.shape_cast %77 : vector<8xf32> to vector<1x1x8xf32>
    tpu.vector_store %arg7[%c1_44, %c0_45, %c0_46], %80 {strides = array<i32>} : memref<2x1x8xf32, #tpu.memory_space<vmem>>, vector<1x1x8xf32>,
    return
  }
  func.func @transform_0(%arg0: i32) -> (i32, i32, i32) {
    %c0_i32 = arith.constant 0 : i32
    %c0_i32_0 = arith.constant 0 : i32
    %c0_i32_1 = arith.constant 0 : i32
    return %arg0, %c0_i32, %c0_i32_0 : i32, i32, i32
  }
  func.func @transform_1(%arg0: i32) -> (i32, i32) {
    %c0_i32 = arith.constant 0 : i32
    %c0_i32_0 = arith.constant 0 : i32
    %c0_i32_1 = arith.constant 0 : i32
    return %c0_i32, %c0_i32_0 : i32, i32
  }
  func.func @transform_2(%arg0: i32) -> (i32, i32) {
    %c0_i32 = arith.constant 0 : i32
    %c0_i32_0 = arith.constant 0 : i32
    %c0_i32_1 = arith.constant 0 : i32
    return %c0_i32, %c0_i32_0 : i32, i32
  }
  func.func @transform_3(%arg0: i32) -> (i32, i32) {
    %c0_i32 = arith.constant 0 : i32
    %c0_i32_0 = arith.constant 0 : i32
    %c0_i32_1 = arith.constant 0 : i32
    return %c0_i32, %c0_i32_0 : i32, i32
  }
  func.func @transform_4(%arg0: i32) -> (i32, i32, i32) {
    %c0_i32 = arith.constant 0 : i32
    %c0_i32_0 = arith.constant 0 : i32
    %c0_i32_1 = arith.constant 0 : i32
    return %arg0, %c0_i32, %c0_i32_0 : i32, i32, i32
  }
  func.func @transform_5(%arg0: i32) -> (i32, i32, i32) {
    %c0_i32 = arith.constant 0 : i32
    %c0_i32_0 = arith.constant 0 : i32
    %c0_i32_1 = arith.constant 0 : i32
    return %arg0, %c0_i32, %c0_i32_0 : i32, i32, i32
  }
  func.func @transform_6(%arg0: i32) -> (i32, i32, i32) {
    %c0_i32 = arith.constant 0 : i32
    %c0_i32_0 = arith.constant 0 : i32
    %c0_i32_1 = arith.constant 0 : i32
    return %arg0, %c0_i32, %c0_i32_0 : i32, i32, i32
  }
}

</mosaic_0001>

<bundles_post_ra>
// kernel: tpu_custom_call.1
= control target key start
LH: loop header
LB: loop body
LE: loop exit
PB: predicated region body
PF: predicated region fallthrough
CT: control target
= control target key end

     0   :  { %12 = vsyncpa [#allocation3], 0  ;;  %vm29_vm0 = vcmask 1043456   ;;  %s812_s0 = inlined_call_operand.vmem [shape: f32[2,4,256], index: 0, kind: input, shape index: {}]   ;;  %s813_s1 = inlined_call_operand.vmem [shape: f32[8,4], index: 1, kind: input, shape index: {}]   ;;  %s814_s2 = inlined_call_operand.vmem [shape: f32[1,8], index: 2, kind: input, shape index: {}]   ;;  %s815_s3 = inlined_call_operand.vmem [shape: f32[8,1], index: 3, kind: input, shape index: {}]   ;;  %s816_s4 = inlined_call_operand.hbm [shape: f32[2,1,8], index: 4, kind: output, shape index: {0}]   ;;  %s817_s5 = inlined_call_operand.hbm [shape: f32[2,8,256], index: 5, kind: output, shape index: {1}]   ;;  %s818_s6 = inlined_call_operand.hbm [shape: f32[2,1,8], index: 6, kind: output, shape index: {2}]  }
   0x1   :  { %v25_v0 = vld [vmem:[%s812_s0] sm:$0xff]  ;;  %v572_v1 = vld [vmem:[%s812_s0 + $0x8] sm:$0xff] }
   0x2   :  { %13 = vsyncpa [#allocation5], 0  ;;  %v27_v2 = vcombine.high %v25_v0, %v25_v0  ;;  %v35_v3 = vsel %vm29_vm0, %v25_v0, 0.0  ;;  %v280_v4 = vcombine.high %v572_v1, %v572_v1  ;;  %v282_v5 = vsel %vm29_vm0, %v572_v1, -inf  ;;  %v22_v21 = vld [vmem:[%s813_s1] sm:$0xff] }
   0x3   :  { %v30_v7 = vsel %vm29_vm0, %v25_v0, -inf  ;;  %v287_v13 = vsel %vm29_vm0, %v572_v1, 0.0  ;;  %v157_v16 = vlaneseq  ;;  %v680_v20 = vmov 0.0   ;;  %v24_v42 = vld [vmem:[%s815_s3] sm:$0xff] }
   0x4   :  { %v36_v6 = vsel %vm29_vm0, %v27_v2, 0.0  ;;  %v31_v8 = vsel %vm29_vm0, %v27_v2, -inf  ;;  %v283_v9 = vsel %vm29_vm0, %v280_v4, -inf  ;;  %v288_v14 = vsel %vm29_vm0, %v280_v4, 0.0  ;;  %240 = vmatprep.mubr.f32.mxu1 %v680_v20  ;;  %582 = vmatprep.subr.mxu0 %v680_v20  ;;  %v23_v52 = vld [vmem:[%s814_s2] sm:$0x1] }
   0x5   :  { %v37_v10 = vadd.f32 %v36_v6, %v35_v3  ;;  %v284_v11 = vmax.f32 %v282_v5, %v283_v9  ;;  %v32_v12 = vmax.f32 %v30_v7, %v31_v8  ;;  %v289_v15 = vadd.f32 %v288_v14, %v287_v13  ;;  %s684_s2 = smov [#allocation4]  }
   0x6   :  { %v158_v17 = vshrl.u32 %v157_v16, 7  ;;  %v270_v18 = vand.u32 127, %v157_v16  ;;  %vm74_vm1 = vcmask 31744   ;;  %vm681_vm2 = vmmov 0   ;;  %s537_s28 = sshll.u32 %s684_s2, 4  ;;  %s538_s28 = int_to_ptr.vmem [resolvable:$true] %s537_s28 }
   0x7   :  { %38 = vadd.xlane.f32.xlu0 %v37_v10  ;;  %285 = vmax.xlane.f32.xlu1 %v284_v11  ;;  %v682_v22 = vmov 839922192   ;;  %v411_v27 = vmul.f32 257.0, %v572_v1  ;;  %v163_v32 = vmul.f32 257.0, %v25_v0  ;;  %v683_v43 = vmov 0   ;;  %s610_s29 = scalar_lea.vmem %s538_s28, 512  ;;  %p615_p1 = scmp.lt.s32.totalorder %s538_s28, %s538_s28 }
   0x8   :  { %v739_v19 = vsub.s32 %v270_v18, %v158_v17  ;;  %583 = vmatpush3.xpose.msk.msra.mxu0 %vm74_vm1, %v22_v21  ;;  %584 = vmatprep.mubr.msk.f32.mxu0 %vm681_vm2, %v680_v20  ;;  %v155_v23 = vunpack.c.l.s4 %v682_v22  ;;  %vm151_vm5 = vcmask 57344   ;;  %p611_p0 = scmp.ne.s32.totalorder %s538_s28, %s610_s29  ;;  %p616_p2 = scmp.lt.s32.totalorder %s610_s29, %s610_s29 }
   0xa   :  { %v156_v24 = vunpack.c.0.s8 %v155_v23  ;;  %p617_p3 = por %p616_p2, %p615_p1 }
   0xb   :  { %33 = vmax.xlane.f32.xlu0 %v32_v12 }
   0xc   :  { %v159_v25 = vsub.s32 %v156_v24, %v158_v17  ;;  %p618_p4 = pnand %p617_p3, %p611_p0 }
   0xf   :  { %290 = vadd.xlane.f32.xlu0 %v289_v15 }
  0x94   :  { %v39_v26 = vpop.xlane.xlu0 %38  ;;  %v286_v28 = vpop.xlane.xlu1 %285 }
  0x95   :  { %v408_v29 = vrot.slane %v286_v28, %v159_v25  ;;  %v40_v30 = vmul.f32 0.00390625, %v39_v26 }
  0x97   :  { %vm410_vm3 = vcmp.eq.f32.partialorder %v572_v1, %v408_v29 }
  0x98   :  { %v34_v31 = vpop.xlane.xlu0 %33  ;;  %v412_v33 = vsel %vm410_vm3, %v411_v27, %v572_v1 }
  0x99   :  { %v160_v34 = vrot.slane %v34_v31, %v159_v25  ;;  %v41_v35 = vadd.f32 %v40_v30, %v34_v31  ;;  %v414_v36 = vcombine.high %v412_v33, %v412_v33 }
  0x9b   :  { %vm162_vm4 = vcmp.eq.f32.partialorder %v25_v0, %v160_v34  ;;  %42 = vxpose.xlu1.b32.start.end [1/1] (short) (narrow) %v41_v35, 8  ;;  %575 = vmatprep.subr.msk.mxu0 %vm29_vm0, %v414_v36 }
  0x9c   :  { %v164_v37 = vsel %vm162_vm4, %v163_v32, %v25_v0  ;;  %v291_v38 = vpop.xlane.xlu0 %290 }
  0x9d   :  { %v171_v39 = vcombine.high %v164_v37, %v164_v37  ;;  %v292_v40 = vmul.f32 0.00390625, %v291_v38 }
  0x9f   :  { %569 = vmatprep.subr.msk.mxu1 %vm29_vm0, %v171_v39  ;;  %v293_v41 = vadd.f32 %v292_v40, %v286_v28 }
  0xa0   :  { %570 = vmatpush1.msk.msra.mxu1 %vm29_vm0, %v164_v37 }
  0xa1   :  { %571 = vmatmul.mubr.msk.f32.vlgmr.msra.gmra.mrb[0].mxu1 %vm74_vm1, %v22_v21  ;;  %294 = vxpose.xlu0.b32.start.end [1/1] (short) (narrow) %v293_v41, 8 }
  0xa2   :  { %587 = vmatprep.subr.mxu1 %v680_v20  ;;  %589 = vmatprep.mubr.msk.f32.mxu1 %vm681_vm2, %v680_v20 }
  0xa7   :  { %588 = vmatpush3.xpose.msk.msra.mxu1 %vm74_vm1, %v22_v21 }
  0xb9   :  { %602 = vset.pattern.permute.xlu1 %v683_v43 }
  0xba   :  { %167 = vperm.xlu1 %602, %v24_v42  }
  0xca   :  { %603 = vset.pattern.permute.xlu0 %v683_v43 }
 0x11b   :  { %v58_v44 = vpop.trf.xlu1 }
 0x11c   :  { %585 = vmatmul.mubr.msk.f32.vlgmr.msra.gmra.mrb[0].mxu0 %vm74_vm1, %v58_v44 }
 0x11d   :  { %576 = vmatpush1.msk.msra.mxu0 %vm29_vm0, %v412_v33  ;;  %483 = vmatprep.mubr.f32.mxu0 %v680_v20 }
 0x120   :  { %577 = vmatmul.mubr.msk.f32.vlgmr.msra.gmra.mrb[2].mxu0 %vm74_vm1, %v22_v21 }
 0x121   :  { %v310_v51 = vpop.trf.xlu0 }
 0x122   :  { %590 = vmatmul.mubr.msk.f32.vlgmr.msra.gmra.mrb[2].mxu1 %vm74_vm1, %v310_v51 }
 0x139   :  { %v168_v45 = vpop.permute.xlu1 %167 }
 0x174   :  { %v242_v46 = vpop.f32.mrb[0].mxu1 }
 0x175   :  { %v243_v47 = vadd.f32 %v242_v46, %v168_v45  ;;  %v244_v48 = vpop.f32.mrb[1].mxu1 }
 0x176   :  { %v245_v49 = vadd.f32 %v244_v48, %v168_v45 }
 0x177   :  { %247 = vst [vmem:[#allocation4] sm:$0xff] %v243_v47 }
 0x178   :  { %248 = vst [vmem:[#allocation4 + $0x8] sm:$0xff] %v245_v49  ;;  %v249_v50 = vadd.f32 %v245_v49, %v243_v47 }
 0x17a   :  { %250 = vadd.xlane.f32.xlu0 %v249_v50 }
 0x1ef   :  { %v147_v53 = vpop.f32.mrb[0].mxu0 }
 0x1f0   :  { %v148_v54 = vadd.f32 %v147_v53, %v23_v52  ;;  %v586_v55 = vpop.f32.mrb[1].mxu0 }
 0x1f2   :  { %152 = vst.msk [vmem:[#allocation2] sm:$0x1] %vm151_vm5, %v148_v54 }
 0x1f3   :  { %v485_v56 = vpop.f32.mrb[2].mxu0 }
 0x1f4   :  { %v486_v57 = vadd.f32 %v485_v56, %v168_v45  ;;  %v487_v58 = vpop.f32.mrb[3].mxu0 }
 0x1f5   :  { %v488_v59 = vadd.f32 %v487_v58, %v168_v45  ;;  %v395_v14 = vpop.f32.mrb[2].mxu1 }
 0x1f6   :  { %491 = vst [vmem:[#allocation4 + $0x10] sm:$0xff] %v486_v57  ;;  %v396_v15 = vadd.f32 %v395_v14, %v23_v52  ;;  %v591_v16 = vpop.f32.mrb[3].mxu1 }
 0x1f7   :  { %492 = vst [vmem:[#allocation4 + $0x18] sm:$0xff] %v488_v59  ;;  %v493_v60 = vadd.f32 %v488_v59, %v486_v57 }
 0x1f8   :  { %400 = vst.msk [vmem:[#allocation2 + $0x1] sm:$0x1] %vm151_vm5, %v396_v15 }
 0x1f9   :  { %494 = vadd.xlane.f32.xlu1 %v493_v60 }
 0x207   :  { %v251_v61 = vpop.xlane.xlu0 %250 }
 0x208   :  { %v252_v62 = vmul.f32 0.00390625, %v251_v61 }
 0x20a   :  { %v253_v63 = vsub.f32 %v243_v47, %v252_v62  ;;  %v254_v0 = vsub.f32 %v245_v49, %v252_v62 }
 0x20c   :  { %v255_v1 = vmul.f32 %v253_v63, %v253_v63  ;;  %v256_v2 = vmul.f32 %v254_v0, %v254_v0 }
 0x20e   :  { %v257_v3 = vadd.f32 %v256_v2, %v255_v1 }
 0x210   :  { %258 = vadd.xlane.f32.xlu0 %v257_v3 }
 0x286   :  { %v495_v4 = vpop.xlane.xlu1 %494 }
 0x287   :  { %v496_v5 = vmul.f32 0.00390625, %v495_v4 }
 0x289   :  { %v497_v6 = vsub.f32 %v486_v57, %v496_v5  ;;  %v498_v7 = vsub.f32 %v488_v59, %v496_v5 }
 0x28b   :  { %v499_v8 = vmul.f32 %v497_v6, %v497_v6  ;;  %v500_v9 = vmul.f32 %v498_v7, %v498_v7 }
 0x28d   :  { %v501_v10 = vadd.f32 %v500_v9, %v499_v8 }
 0x28f   :  { %502 = vadd.xlane.f32.xlu0 %v501_v10 }
 0x29d   :  { %v259_v11 = vpop.xlane.xlu0 %258 }
 0x29e   :  { %v260_v12 = vmul.f32 0.003921569, %v259_v11 }
 0x2a0   :  { %606 = vrsqrt.f32 %v260_v12  ;;  %vm263_vm6 = vcmp.eq.f32.partialorder %v260_v12, inf  ;;  %v266_v18 = vand.u32 2147483648, %v260_v12 }
 0x2aa   :  { %v607_v13 = vpop.eup %606 }
 0x2ab   :  { %v262_v17 = vmul.f32 %v607_v13, %v260_v12 }
 0x2ac   :  { %621 = shalt.err (!%p618_p4)
}
 0x2ad   :  { %s622_s8 = scalar_lea.hbm %s817_s5, 512 }
 0x2ae   :  { %p623_p5 = scmp.ne.s32.totalorder %s817_s5, %s622_s8  ;;  %p626_p6 = scmp.lt.u32.totalorder %s622_s8, %s817_s5 }
 0x2b0   :  { %p628_p7 = pnand %p626_p6, %p623_p5 }
 0x2b2   :  { %631 = shalt.err (!%p628_p7)
}
 0x2b3   :  { %s685_s13 = smov 256   ;;  %s686_s14 = smov 16   ;;  %v264_v20 = vsel %vm263_vm6, %v260_v12, %v262_v17  ;;  %vm265_vm7 = vcmp.eq.f32.partialorder %v260_v12, 0.0 }
 0x2b4   :  { %543 = dma.vmem_to_hbm [thread:$0]  %s538_s28, 512, %s817_s5, [#allocation5], %s685_s13, %s685_s13, %s686_s14   ;;  %v267_v21 = vsel %vm265_vm7, %v266_v18, %v264_v20 }
 0x2b5   :  { %s687_s17 = smov [#allocation2]   ;;  %v274_v22 = vrot.slane %v267_v21, %v739_v19 }
 0x2b6   :  { %s525_s18 = sshll.u32 %s687_s17, 4  ;;  %s526_s18 = int_to_ptr.vmem [resolvable:$true] %s525_s18 }
 0x2b7   :  { %s632_s19 = scalar_lea.vmem %s526_s18, 32  ;;  %p637_p9 = scmp.lt.s32.totalorder %s526_s18, %s526_s18 }
 0x2b8   :  { %p633_p8 = scmp.ne.s32.totalorder %s526_s18, %s632_s19  ;;  %p638_p10 = scmp.lt.s32.totalorder %s632_s19, %s632_s19 }
 0x2ba   :  { %p639_p11 = por %p638_p10, %p637_p9 }
 0x2bc   :  { %p640_p12 = pnand %p639_p11, %p633_p8 }
 0x2be   :  { %643 = shalt.err (!%p640_p12)
}
 0x2bf   :  { %s644_s5 = scalar_lea.hbm %s816_s4, 32 }
 0x2c0   :  { %p645_p13 = scmp.ne.s32.totalorder %s816_s4, %s644_s5  ;;  %p648_p0 = scmp.lt.u32.totalorder %s644_s5, %s816_s4 }
 0x2c2   :  { %p650_p1 = pnand %p648_p0, %p645_p13 }
 0x2c4   :  { %653 = shalt.err (!%p650_p1)
}
 0x2c5   :  { %s688_s25 = smov 1   ;;  %276 = vst.msk [vmem:[#allocation6] sm:$0x1] %vm151_vm5, %v274_v22  ;;  %s689_s3 = smov [#allocation6]  }
 0x2c6   :  { %531 = dma.vmem_to_hbm [thread:$0]  %s526_s18, 32, %s816_s4, [#allocation3], %s686_s14, %s686_s14, %s688_s25  }
 0x2c7   :  { %s549_s27 = sshll.u32 %s689_s3, 4  ;;  %s550_s27 = int_to_ptr.vmem [resolvable:$true] %s549_s27 }
 0x2c8   :  { %s654_s4 = scalar_lea.vmem %s550_s27, 32  ;;  %p659_p3 = scmp.lt.s32.totalorder %s550_s27, %s550_s27 }
 0x2c9   :  { %p655_p2 = scmp.ne.s32.totalorder %s550_s27, %s654_s4  ;;  %p660_p4 = scmp.lt.s32.totalorder %s654_s4, %s654_s4 }
 0x2cb   :  { %p661_p5 = por %p660_p4, %p659_p3 }
 0x2cd   :  { %p662_p6 = pnand %p661_p5, %p655_p2 }
 0x31c   :  { %v503_v23 = vpop.xlane.xlu0 %502 }
 0x31d   :  { %v504_v24 = vmul.f32 0.003921569, %v503_v23 }
 0x31f   :  { %608 = vrsqrt.f32 %v504_v24  ;;  %vm507_vm8 = vcmp.eq.f32.partialorder %v504_v24, inf  ;;  %v510_v27 = vand.u32 2147483648, %v504_v24  ;;  %vm509_vm9 = vcmp.eq.f32.partialorder %v504_v24, 0.0 }
 0x329   :  { %v609_v25 = vpop.eup %608 }
 0x32a   :  { %v506_v26 = vmul.f32 %v609_v25, %v504_v24 }
 0x32c   :  { %v508_v28 = vsel %vm507_vm8, %v504_v24, %v506_v26 }
 0x32d   :  { %v511_v29 = vsel %vm509_vm9, %v510_v27, %v508_v28 }
 0x32e   :  { %v516_v30 = vrot.slane %v511_v29, %v739_v19 }
 0x330   :  { %519 = vst.msk [vmem:[#allocation6 + $0x1] sm:$0x1] %vm151_vm5, %v516_v30 }
 0x331   :  { %665 = shalt.err (!%p662_p6)
}
 0x332   :  { %s666_s29 = scalar_lea.hbm %s818_s6, 32 }
 0x333   :  { %p667_p7 = scmp.ne.s32.totalorder %s818_s6, %s666_s29  ;;  %p670_p8 = scmp.lt.u32.totalorder %s666_s29, %s818_s6 }
 0x335   :  { %p672_p9 = pnand %p670_p8, %p667_p7 }
 0x337   :  { %675 = shalt.err (!%p672_p9)
}
 0x338   :  { %555 = dma.vmem_to_hbm [thread:$0]  %s550_s27, 32, %s818_s6, [#allocation5], %s686_s14, %s686_s14, %s688_s25  }
 0x339   :  { %676 = dma.done.wait [#allocation3], 32  }
 0x33a   :  { %677 = vsyncadd [#allocation3], 4294967264 }
 0x33b   :  { %678 = dma.done.wait [#allocation5], 544  }
 0x33c   :  { %679 = vsyncadd [#allocation5], 4294966752 }
 0x33d   :  { %565 = vsyncpa [#allocation3], 1 }
 0x33e   :  { %566 = vsyncpa [#allocation5], 1 }

</bundles_post_ra>
